<compile_context>
chip_gen: v5e
topology: v5e:2x2
jax: 0.10.0
libtpu: 0.0.40
codegen_flags: <defaults>
</compile_context>

<pallas_src>
import jax
import jax.numpy as jnp
from jax.experimental import pallas as pl
from jax.experimental.pallas import tpu as pltpu


def ffwvae_kernel(x_ref, eps_ref,
                  w1_ref, b1_ref,
                  w2mu_ref, b2mu_ref, w2lv_ref, b2lv_ref,
                  w3_ref, b3_ref, w4_ref, b4_ref,
                  recon_ref, side_ref):
    """Processes one batch tile. Matmuls in bf16 (f32 accum), math in f32."""
    x = x_ref[...]

    # --- Encoder ---------------------------------------------------------
    h1 = jnp.tanh(
        jnp.dot(x.astype(jnp.bfloat16), w1_ref[...],
                preferred_element_type=jnp.float32) + b1_ref[...])
    h1_bf = h1.astype(jnp.bfloat16)

    # Two lane-aligned dots produce mu / logvar directly (no mid-lane split).
    mu = jnp.tanh(
        jnp.dot(h1_bf, w2mu_ref[...], preferred_element_type=jnp.float32)
        + b2mu_ref[...])
    logvar = jnp.tanh(
        jnp.dot(h1_bf, w2lv_ref[...], preferred_element_type=jnp.float32)
        + b2lv_ref[...])

    # --- Reparameterize (f32): z = mu + eps * exp(0.5 * logvar) -----------
    z = mu + eps_ref[...] * jnp.exp(0.5 * logvar)

    # --- Decoder ----------------------------------------------------------
    # TODO(synk): with K = hsize << 128 the z @ W3 dot under-fills the MXU;
    # acceptable — it is latency- not throughput-dominated at these sizes.
    h3 = jnp.maximum(
        jnp.dot(z.astype(jnp.bfloat16), w3_ref[...],
                preferred_element_type=jnp.float32) + b3_ref[...],
        0.0)
    recon = jax.nn.sigmoid(
        jnp.dot(h3.astype(jnp.bfloat16), w4_ref[...],
                preferred_element_type=jnp.float32) + b4_ref[...])

    recon_ref[...] = recon.astype(recon_ref.dtype)
    # One packed side-output slab [3, TB, hsize]; aligned full-slice stores.
    side_ref[0] = z.astype(side_ref.dtype)
    side_ref[1] = mu.astype(side_ref.dtype)
    side_ref[2] = logvar.astype(side_ref.dtype)


def _resident_spec(shape):
    # Whole-array block with a constant index map: stays resident in VMEM
    # across all batch tiles (no re-DMA per grid step).
    return pl.BlockSpec(shape, lambda i: (0,) * len(shape))


def _prepare_kernel_params(params, hsize):
    """Cast matmul weights to bf16 and split W2/b2 into mu / logvar halves."""
    w2, b2 = params["w2"], params["b2"]
    return dict(
        w1=params["w1"].astype(jnp.bfloat16), b1=params["b1"],
        w2_mu=w2[:, :hsize].astype(jnp.bfloat16), b2_mu=b2[:, :hsize],
        w2_lv=w2[:, hsize:].astype(jnp.bfloat16), b2_lv=b2[:, hsize:],
        w3=params["w3"].astype(jnp.bfloat16), b3=params["b3"],
        w4=params["w4"].astype(jnp.bfloat16), b4=params["b4"],
    )


def _vmem_limit_bytes(tb, isize, hsize, q, weight_bytes):
    # Streamed tensors (x, eps, recon, side) are double-buffered f32 tiles;
    # weights counted twice for safety; plus f32 intermediates and headroom.
    streamed = 4 * tb * (2 * isize + 4 * hsize)
    activations = 4 * tb * (2 * q + 4 * hsize + isize)
    est = 2 * streamed + 2 * weight_bytes + activations + (4 << 20)
    # Cap at 64 MiB so the limit is valid on v7x (64 MiB VMEM per TC).
    return int(min(max(est, 16 << 20), 64 << 20))


def ffwvae_forward(x, params, eps, *, block_b=None):
    """x: [B, isize] f32; params: dict of [in,out] f32 weights / [1,out] f32
    biases; eps: [B, hsize] f32. Returns (recon, z, mu, logvar)."""
    B, isize = x.shape
    hsize = eps.shape[-1]
    q = isize // 4

    if block_b is None:
        block_b = min(B, 256)
    block_b = min(block_b, B)
    grid_b = pl.cdiv(B, block_b)

    kp = _prepare_kernel_params(params, hsize)
    inputs = (x, eps,
              kp["w1"], kp["b1"],
              kp["w2_mu"], kp["b2_mu"], kp["w2_lv"], kp["b2_lv"],
              kp["w3"], kp["b3"], kp["w4"], kp["b4"])

    in_specs = [
        pl.BlockSpec((block_b, isize), lambda i: (i, 0)),   # x   (streamed)
        pl.BlockSpec((block_b, hsize), lambda i: (i, 0)),   # eps (streamed)
    ] + [_resident_spec(a.shape) for a in inputs[2:]]       # weights/biases

    out_shape = (
        jax.ShapeDtypeStruct((B, isize), jnp.float32),      # reconstruction
        jax.ShapeDtypeStruct((3, B, hsize), jnp.float32),   # packed z/mu/logvar
    )
    out_specs = (
        pl.BlockSpec((block_b, isize), lambda i: (i, 0)),
        pl.BlockSpec((3, block_b, hsize), lambda i: (0, i, 0)),
    )

    weight_bytes = sum(int(a.size) * a.dtype.itemsize for a in inputs[2:])
    flops = 2 * B * (isize * q + q * 2 * hsize + hsize * q + q * isize)
    transcendentals = B * (q + 2 * hsize + hsize + isize)
    bytes_accessed = int(4 * (x.size + eps.size + B * isize + 3 * B * hsize)
                         + weight_bytes)

    recon, side = pl.pallas_call(
        ffwvae_kernel,
        out_shape=out_shape,
        grid=(grid_b,),
        in_specs=in_specs,
        out_specs=out_specs,
        compiler_params=pltpu.CompilerParams(
            dimension_semantics=("parallel",),
            vmem_limit_bytes=_vmem_limit_bytes(block_b, isize, hsize, q,
                                               weight_bytes)),
        cost_estimate=pl.CostEstimate(flops=flops,
                                      transcendentals=transcendentals,
                                      bytes_accessed=bytes_accessed),
    )(*inputs)

    z, mu, logvar = side[0], side[1], side[2]
    return recon, z, mu, logvar


def init_params(key, isize, hsize):
    """nn.Linear-style init; weights stored transposed as [in, out] f32."""
    q = isize // 4

    def linear(k, fan_in, fan_out):
        kw, kb = jax.random.split(k)
        bound = 1.0 / jnp.sqrt(fan_in)
        w = jax.random.uniform(kw, (fan_in, fan_out), jnp.float32, -bound, bound)
        b = jax.random.uniform(kb, (1, fan_out), jnp.float32, -bound, bound)
        return w, b

    k1, k2, k3, k4 = jax.random.split(key, 4)
    w1, b1 = linear(k1, isize, q)          # enc1: isize -> isize//4
    w2, b2 = linear(k2, q, hsize * 2)      # enc2: isize//4 -> 2*hsize
    w3, b3 = linear(k3, hsize, q)          # dec1: hsize -> isize//4
    w4, b4 = linear(k4, q, isize)          # dec2: isize//4 -> isize
    return dict(w1=w1, b1=b1, w2=w2, b2=b2, w3=w3, b3=b3, w4=w4, b4=b4)


def reference_forward(x, params, eps):
    """Pure-JAX reference mirroring the kernel's bf16-operand / f32-accum dots."""
    def bdot(a, w):
        return jnp.dot(a.astype(jnp.bfloat16), w.astype(jnp.bfloat16),
                       preferred_element_type=jnp.float32)

    h1 = jnp.tanh(bdot(x, params["w1"]) + params["b1"])
    h2 = jnp.tanh(bdot(h1, params["w2"]) + params["b2"])
    hsize = eps.shape[-1]
    mu, logvar = h2[:, :hsize], h2[:, hsize:]
    z = mu + eps * jnp.exp(0.5 * logvar)
    h3 = jax.nn.relu(bdot(z, params["w3"]) + params["b3"])
    recon = jax.nn.sigmoid(bdot(h3, params["w4"]) + params["b4"])
    return recon, z, mu, logvar


if __name__ == "__main__":
    B, ISIZE, HSIZE = 16, 32, 8     # small shapes; isize divisible by 4
    BLOCK_B = 8                     # 2 batch tiles -> exercises the grid

    key = jax.random.PRNGKey(0)
    k_params, k_x, k_eps = jax.random.split(key, 3)

    params = init_params(k_params, ISIZE, HSIZE)
    x = jax.random.normal(k_x, (B, ISIZE), jnp.float32)
    eps = jax.random.normal(k_eps, (B, HSIZE), jnp.float32)  # torch.randn_like(std)

    recon, z, mu, logvar = jax.block_until_ready(
        ffwvae_forward(x, params, eps, block_b=BLOCK_B))

    # Sanity-check against the pure-JAX reference.
    r_ref, z_ref, mu_ref, lv_ref = reference_forward(x, params, eps)
    assert jnp.allclose(recon, r_ref, atol=2e-3, rtol=2e-3)
    assert jnp.allclose(z, z_ref, atol=2e-3, rtol=2e-3)
    assert jnp.allclose(mu, mu_ref, atol=2e-3, rtol=2e-3)
    assert jnp.allclose(logvar, lv_ref, atol=2e-3, rtol=2e-3)

    print("KERNEL_OK")
</pallas_src>

<mosaic_0001>
module attributes {stable_mosaic.version = 11 : i64} {
  func.func @ffwvae_kernel(%arg0: i32, %arg1: memref<8x32xf32, #tpu.memory_space<vmem>>, %arg2: memref<8x8xf32, #tpu.memory_space<vmem>>, %arg3: memref<32x8xbf16, #tpu.memory_space<vmem>>, %arg4: memref<1x8xf32, #tpu.memory_space<vmem>>, %arg5: memref<8x8xbf16, #tpu.memory_space<vmem>>, %arg6: memref<1x8xf32, #tpu.memory_space<vmem>>, %arg7: memref<8x8xbf16, #tpu.memory_space<vmem>>, %arg8: memref<1x8xf32, #tpu.memory_space<vmem>>, %arg9: memref<8x8xbf16, #tpu.memory_space<vmem>>, %arg10: memref<1x8xf32, #tpu.memory_space<vmem>>, %arg11: memref<8x32xbf16, #tpu.memory_space<vmem>>, %arg12: memref<1x32xf32, #tpu.memory_space<vmem>>, %arg13: memref<8x32xf32, #tpu.memory_space<vmem>>, %arg14: memref<3x8x8xf32, #tpu.memory_space<vmem>>) attributes {dimension_semantics = [#tpu.dimension_semantics<parallel>], iteration_bounds = array<i64: 2>, scalar_prefetch = 0 : i64, scratch_operands = 0 : i64, tpu.core_type = #tpu.core_type<tc>, window_params = [{transform_indices = @transform_0, window_bounds = array<i64: 8, 32>}, {transform_indices = @transform_1, window_bounds = array<i64: 8, 8>}, {pipeline_mode = #tpu.pipeline_mode<synchronous>, transform_indices = @transform_2, window_bounds = array<i64: 32, 8>}, {pipeline_mode = #tpu.pipeline_mode<synchronous>, transform_indices = @transform_3, window_bounds = array<i64: 1, 8>}, {pipeline_mode = #tpu.pipeline_mode<synchronous>, transform_indices = @transform_4, window_bounds = array<i64: 8, 8>}, {pipeline_mode = #tpu.pipeline_mode<synchronous>, transform_indices = @transform_5, window_bounds = array<i64: 1, 8>}, {pipeline_mode = #tpu.pipeline_mode<synchronous>, transform_indices = @transform_6, window_bounds = array<i64: 8, 8>}, {pipeline_mode = #tpu.pipeline_mode<synchronous>, transform_indices = @transform_7, window_bounds = array<i64: 1, 8>}, {pipeline_mode = #tpu.pipeline_mode<synchronous>, transform_indices = @transform_8, window_bounds = array<i64: 8, 8>}, {pipeline_mode = #tpu.pipeline_mode<synchronous>, transform_indices = @transform_9, window_bounds = array<i64: 1, 8>}, {pipeline_mode = #tpu.pipeline_mode<synchronous>, transform_indices = @transform_10, window_bounds = array<i64: 8, 32>}, {pipeline_mode = #tpu.pipeline_mode<synchronous>, transform_indices = @transform_11, window_bounds = array<i64: 1, 32>}, {transform_indices = @transform_12, window_bounds = array<i64: 8, 32>}, {transform_indices = @transform_13, window_bounds = array<i64: 3, 8, 8>}]} {
    %c0 = arith.constant 0 : index
    %c0_0 = arith.constant 0 : index
    %0 = vector.load %arg1[%c0, %c0_0] : memref<8x32xf32, #tpu.memory_space<vmem>>, vector<8x32xf32>
    %1 = arith.truncf %0 : vector<8x32xf32> to vector<8x32xbf16>
    %c0_1 = arith.constant 0 : index
    %c0_2 = arith.constant 0 : index
    %2 = vector.load %arg3[%c0_1, %c0_2] : memref<32x8xbf16, #tpu.memory_space<vmem>>, vector<32x8xbf16>
    %cst = arith.constant dense<0.000000e+00> : vector<8x8xf32>
    %3 = tpu.matmul %1, %2, %cst {dimension_numbers = #tpu.dot_dimension_numbers<[1], [0], [0], [1], [0, 0, 1, 1], [], []>} : vector<8x32xbf16>, vector<32x8xbf16>, vector<8x8xf32> -> vector<8x8xf32>
    %c0_3 = arith.constant 0 : index
    %c0_4 = arith.constant 0 : index
    %4 = vector.load %arg4[%c0_3, %c0_4] : memref<1x8xf32, #tpu.memory_space<vmem>>, vector<1x8xf32>
    %5 = vector.broadcast %4 : vector<1x8xf32> to vector<8x8xf32>
    %6 = arith.addf %3, %5 : vector<8x8xf32>
    %7 = math.tanh %6 : vector<8x8xf32>
    %8 = arith.truncf %7 : vector<8x8xf32> to vector<8x8xbf16>
    %c0_5 = arith.constant 0 : index
    %c0_6 = arith.constant 0 : index
    %9 = vector.load %arg5[%c0_5, %c0_6] : memref<8x8xbf16, #tpu.memory_space<vmem>>, vector<8x8xbf16>
    %cst_7 = arith.constant dense<0.000000e+00> : vector<8x8xf32>
    %10 = tpu.matmul %8, %9, %cst_7 {dimension_numbers = #tpu.dot_dimension_numbers<[1], [0], [0], [1], [0, 0, 1, 1], [], []>} : vector<8x8xbf16>, vector<8x8xbf16>, vector<8x8xf32> -> vector<8x8xf32>
    %c0_8 = arith.constant 0 : index
    %c0_9 = arith.constant 0 : index
    %11 = vector.load %arg6[%c0_8, %c0_9] : memref<1x8xf32, #tpu.memory_space<vmem>>, vector<1x8xf32>
    %12 = vector.broadcast %11 : vector<1x8xf32> to vector<8x8xf32>
    %13 = arith.addf %10, %12 : vector<8x8xf32>
    %14 = math.tanh %13 : vector<8x8xf32>
    %c0_10 = arith.constant 0 : index
    %c0_11 = arith.constant 0 : index
    %15 = vector.load %arg7[%c0_10, %c0_11] : memref<8x8xbf16, #tpu.memory_space<vmem>>, vector<8x8xbf16>
    %cst_12 = arith.constant dense<0.000000e+00> : vector<8x8xf32>
    %16 = tpu.matmul %8, %15, %cst_12 {dimension_numbers = #tpu.dot_dimension_numbers<[1], [0], [0], [1], [0, 0, 1, 1], [], []>} : vector<8x8xbf16>, vector<8x8xbf16>, vector<8x8xf32> -> vector<8x8xf32>
    %c0_13 = arith.constant 0 : index
    %c0_14 = arith.constant 0 : index
    %17 = vector.load %arg8[%c0_13, %c0_14] : memref<1x8xf32, #tpu.memory_space<vmem>>, vector<1x8xf32>
    %18 = vector.broadcast %17 : vector<1x8xf32> to vector<8x8xf32>
    %19 = arith.addf %16, %18 : vector<8x8xf32>
    %20 = math.tanh %19 : vector<8x8xf32>
    %c0_15 = arith.constant 0 : index
    %c0_16 = arith.constant 0 : index
    %21 = vector.load %arg2[%c0_15, %c0_16] : memref<8x8xf32, #tpu.memory_space<vmem>>, vector<8x8xf32>
    %cst_17 = arith.constant 5.000000e-01 : f32
    %22 = vector.broadcast %cst_17 : f32 to vector<8x8xf32>
    %23 = arith.mulf %22, %20 : vector<8x8xf32>
    %24 = math.exp %23 : vector<8x8xf32>
    %25 = arith.mulf %21, %24 : vector<8x8xf32>
    %26 = arith.addf %14, %25 : vector<8x8xf32>
    %27 = arith.truncf %26 : vector<8x8xf32> to vector<8x8xbf16>
    %c0_18 = arith.constant 0 : index
    %c0_19 = arith.constant 0 : index
    %28 = vector.load %arg9[%c0_18, %c0_19] : memref<8x8xbf16, #tpu.memory_space<vmem>>, vector<8x8xbf16>
    %cst_20 = arith.constant dense<0.000000e+00> : vector<8x8xf32>
    %29 = tpu.matmul %27, %28, %cst_20 {dimension_numbers = #tpu.dot_dimension_numbers<[1], [0], [0], [1], [0, 0, 1, 1], [], []>} : vector<8x8xbf16>, vector<8x8xbf16>, vector<8x8xf32> -> vector<8x8xf32>
    %c0_21 = arith.constant 0 : index
    %c0_22 = arith.constant 0 : index
    %30 = vector.load %arg10[%c0_21, %c0_22] : memref<1x8xf32, #tpu.memory_space<vmem>>, vector<1x8xf32>
    %31 = vector.broadcast %30 : vector<1x8xf32> to vector<8x8xf32>
    %32 = arith.addf %29, %31 : vector<8x8xf32>
    %cst_23 = arith.constant 0.000000e+00 : f32
    %33 = vector.broadcast %cst_23 : f32 to vector<8x8xf32>
    %34 = arith.maximumf %32, %33 : vector<8x8xf32>
    %35 = arith.truncf %34 : vector<8x8xf32> to vector<8x8xbf16>
    %c0_24 = arith.constant 0 : index
    %c0_25 = arith.constant 0 : index
    %36 = vector.load %arg11[%c0_24, %c0_25] : memref<8x32xbf16, #tpu.memory_space<vmem>>, vector<8x32xbf16>
    %cst_26 = arith.constant dense<0.000000e+00> : vector<8x32xf32>
    %37 = tpu.matmul %35, %36, %cst_26 {dimension_numbers = #tpu.dot_dimension_numbers<[1], [0], [0], [1], [0, 0, 1, 1], [], []>} : vector<8x8xbf16>, vector<8x32xbf16>, vector<8x32xf32> -> vector<8x32xf32>
    %c0_27 = arith.constant 0 : index
    %c0_28 = arith.constant 0 : index
    %38 = vector.load %arg12[%c0_27, %c0_28] : memref<1x32xf32, #tpu.memory_space<vmem>>, vector<1x32xf32>
    %39 = vector.broadcast %38 : vector<1x32xf32> to vector<8x32xf32>
    %40 = arith.addf %37, %39 : vector<8x32xf32>
    %41 = arith.negf %40 : vector<8x32xf32>
    %42 = math.exp %41 : vector<8x32xf32>
    %cst_29 = arith.constant 1.000000e+00 : f32
    %43 = vector.broadcast %cst_29 : f32 to vector<8x32xf32>
    %44 = arith.addf %43, %42 : vector<8x32xf32>
    %45 = arith.divf %43, %44 : vector<8x32xf32>
    %c0_30 = arith.constant 0 : index
    %c0_31 = arith.constant 0 : index
    %46 = vector.load %arg13[%c0_30, %c0_31] : memref<8x32xf32, #tpu.memory_space<vmem>>, vector<8x32xf32>
    tpu.vector_store %arg13[%c0_30, %c0_31], %45 {strides = array<i32>} : memref<8x32xf32, #tpu.memory_space<vmem>>, vector<8x32xf32>,
    %c0_32 = arith.constant 0 : index
    %c0_33 = arith.constant 0 : index
    %c0_34 = arith.constant 0 : index
    %47 = vector.load %arg14[%c0_32, %c0_33, %c0_34] : memref<3x8x8xf32, #tpu.memory_space<vmem>>, vector<1x8x8xf32>
    %48 = vector.shape_cast %47 : vector<1x8x8xf32> to vector<8x8xf32>
    %49 = vector.shape_cast %26 : vector<8x8xf32> to vector<1x8x8xf32>
    tpu.vector_store %arg14[%c0_32, %c0_33, %c0_34], %49 {strides = array<i32>} : memref<3x8x8xf32, #tpu.memory_space<vmem>>, vector<1x8x8xf32>,
    %c1 = arith.constant 1 : index
    %c0_35 = arith.constant 0 : index
    %c0_36 = arith.constant 0 : index
    %50 = vector.load %arg14[%c1, %c0_35, %c0_36] : memref<3x8x8xf32, #tpu.memory_space<vmem>>, vector<1x8x8xf32>
    %51 = vector.shape_cast %50 : vector<1x8x8xf32> to vector<8x8xf32>
    %52 = vector.shape_cast %14 : vector<8x8xf32> to vector<1x8x8xf32>
    tpu.vector_store %arg14[%c1, %c0_35, %c0_36], %52 {strides = array<i32>} : memref<3x8x8xf32, #tpu.memory_space<vmem>>, vector<1x8x8xf32>,
    %c2 = arith.constant 2 : index
    %c0_37 = arith.constant 0 : index
    %c0_38 = arith.constant 0 : index
    %53 = vector.load %arg14[%c2, %c0_37, %c0_38] : memref<3x8x8xf32, #tpu.memory_space<vmem>>, vector<1x8x8xf32>
    %54 = vector.shape_cast %53 : vector<1x8x8xf32> to vector<8x8xf32>
    %55 = vector.shape_cast %20 : vector<8x8xf32> to vector<1x8x8xf32>
    tpu.vector_store %arg14[%c2, %c0_37, %c0_38], %55 {strides = array<i32>} : memref<3x8x8xf32, #tpu.memory_space<vmem>>, vector<1x8x8xf32>,
    return
  }
  func.func @transform_0(%arg0: i32) -> (i32, i32) {
    %c0_i32 = arith.constant 0 : i32
    %c0_i32_0 = arith.constant 0 : i32
    return %arg0, %c0_i32 : i32, i32
  }
  func.func @transform_1(%arg0: i32) -> (i32, i32) {
    %c0_i32 = arith.constant 0 : i32
    %c0_i32_0 = arith.constant 0 : i32
    return %arg0, %c0_i32 : i32, i32
  }
  func.func @transform_2(%arg0: i32) -> (i32, i32) {
    %c0_i32 = arith.constant 0 : i32
    %c0_i32_0 = arith.constant 0 : i32
    %c0_i32_1 = arith.constant 0 : i32
    return %c0_i32, %c0_i32_0 : i32, i32
  }
  func.func @transform_3(%arg0: i32) -> (i32, i32) {
    %c0_i32 = arith.constant 0 : i32
    %c0_i32_0 = arith.constant 0 : i32
    %c0_i32_1 = arith.constant 0 : i32
    return %c0_i32, %c0_i32_0 : i32, i32
  }
  func.func @transform_4(%arg0: i32) -> (i32, i32) {
    %c0_i32 = arith.constant 0 : i32
    %c0_i32_0 = arith.constant 0 : i32
    %c0_i32_1 = arith.constant 0 : i32
    return %c0_i32, %c0_i32_0 : i32, i32
  }
  func.func @transform_5(%arg0: i32) -> (i32, i32) {
    %c0_i32 = arith.constant 0 : i32
    %c0_i32_0 = arith.constant 0 : i32
    %c0_i32_1 = arith.constant 0 : i32
    return %c0_i32, %c0_i32_0 : i32, i32
  }
  func.func @transform_6(%arg0: i32) -> (i32, i32) {
    %c0_i32 = arith.constant 0 : i32
    %c0_i32_0 = arith.constant 0 : i32
    %c0_i32_1 = arith.constant 0 : i32
    return %c0_i32, %c0_i32_0 : i32, i32
  }
  func.func @transform_7(%arg0: i32) -> (i32, i32) {
    %c0_i32 = arith.constant 0 : i32
    %c0_i32_0 = arith.constant 0 : i32
    %c0_i32_1 = arith.constant 0 : i32
    return %c0_i32, %c0_i32_0 : i32, i32
  }
  func.func @transform_8(%arg0: i32) -> (i32, i32) {
    %c0_i32 = arith.constant 0 : i32
    %c0_i32_0 = arith.constant 0 : i32
    %c0_i32_1 = arith.constant 0 : i32
    return %c0_i32, %c0_i32_0 : i32, i32
  }
  func.func @transform_9(%arg0: i32) -> (i32, i32) {
    %c0_i32 = arith.constant 0 : i32
    %c0_i32_0 = arith.constant 0 : i32
    %c0_i32_1 = arith.constant 0 : i32
    return %c0_i32, %c0_i32_0 : i32, i32
  }
  func.func @transform_10(%arg0: i32) -> (i32, i32) {
    %c0_i32 = arith.constant 0 : i32
    %c0_i32_0 = arith.constant 0 : i32
    %c0_i32_1 = arith.constant 0 : i32
    return %c0_i32, %c0_i32_0 : i32, i32
  }
  func.func @transform_11(%arg0: i32) -> (i32, i32) {
    %c0_i32 = arith.constant 0 : i32
    %c0_i32_0 = arith.constant 0 : i32
    %c0_i32_1 = arith.constant 0 : i32
    return %c0_i32, %c0_i32_0 : i32, i32
  }
  func.func @transform_12(%arg0: i32) -> (i32, i32) {
    %c0_i32 = arith.constant 0 : i32
    %c0_i32_0 = arith.constant 0 : i32
    return %arg0, %c0_i32 : i32, i32
  }
  func.func @transform_13(%arg0: i32) -> (i32, i32, i32) {
    %c0_i32 = arith.constant 0 : i32
    %c0_i32_0 = arith.constant 0 : i32
    %c0_i32_1 = arith.constant 0 : i32
    return %c0_i32, %arg0, %c0_i32_0 : i32, i32, i32
  }
}

</mosaic_0001>

<bundles_post_ra>
// kernel: tpu_custom_call.1
= control target key start
LH: loop header
LB: loop body
LE: loop exit
PB: predicated region body
PF: predicated region fallthrough
CT: control target
= control target key end

     0   :  { %s1182_s0 = inlined_call_operand.vmem [shape: f32[16,32], index: 0, kind: input, shape index: {}]   ;;  %s1183_s1 = inlined_call_operand.vmem [shape: f32[16,8], index: 1, kind: input, shape index: {}]   ;;  %s1184_s2 = inlined_call_operand.vmem [shape: bf16[32,8], index: 2, kind: input, shape index: {}]   ;;  %s1185_s3 = inlined_call_operand.vmem [shape: f32[1,8], index: 3, kind: input, shape index: {}]   ;;  %s1186_s4 = inlined_call_operand.vmem [shape: bf16[8,8], index: 4, kind: input, shape index: {}]   ;;  %s1187_s5 = inlined_call_operand.vmem [shape: f32[1,8], index: 5, kind: input, shape index: {}]   ;;  %s1188_s6 = inlined_call_operand.vmem [shape: bf16[8,8], index: 6, kind: input, shape index: {}]   ;;  %s1189_s7 = inlined_call_operand.vmem [shape: f32[1,8], index: 7, kind: input, shape index: {}]   ;;  %s1190_s8 = inlined_call_operand.vmem [shape: bf16[8,8], index: 8, kind: input, shape index: {}]   ;;  %s1191_s9 = inlined_call_operand.vmem [shape: f32[1,8], index: 9, kind: input, shape index: {}]   ;;  %s1192_s10 = inlined_call_operand.vmem [shape: bf16[8,32], index: 10, kind: input, shape index: {}]   ;;  %s1193_s11 = inlined_call_operand.vmem [shape: f32[1,32], index: 11, kind: input, shape index: {}]   ;;  %s1194_s12 = inlined_call_operand.hbm [shape: f32[16,32], index: 12, kind: output, shape index: {0}]   ;;  %s1195_s13 = inlined_call_operand.vmem [shape: f32[3,16,8], index: 13, kind: output, shape index: {1}]  }
   0x1   :  { %1197 = sst [smem:[#allocation7_spill]] %s1182_s0 }
   0x2   :  { %1198 = sst [smem:[#allocation8_spill]] %s1183_s1 }
   0x3   :  { %1199 = sst [smem:[#allocation9_spill]] %s1184_s2 }
   0x4   :  { %1200 = sst [smem:[#allocation10_spill]] %s1185_s3 }
   0x5   :  { %1201 = sst [smem:[#allocation11_spill]] %s1186_s4 }
   0x6   :  { %19 = vsyncpa [#allocation3], 0 }
   0x7   :  { %21 = vsyncpa [#allocation3 + $0x1], 0  ;;  %s1019_s25 = smov 0   ;;  %s1021_s26 = smov 0  }
   0x8   :  { %s1023_s27 = smov 0   ;;  %s1025_s28 = smov 0  }
   0x9 LB: > { %s1040_s29 = sadd.s32 4294967295, %s947_s28   ;;  %s798_s30 = sadd.s32 4294967294, %s947_s28   ;;  %s947_s28 = sphi %s1025_s28, %s1215_s28   ;;  %s943_s27 = sphi %s1023_s27, %s1214_s27   ;;  %s939_s26 = sphi %s1021_s26, %s1213_s26   ;;  %s935_s25 = sphi %s1019_s25, %s1212_s25  }
   0xa   : > { %s1044_s14 = sadd.s32 1, %s947_s28   ;;  %s296_s15 = sadd.s32 1, %s943_s27 }
   0xb   : > { %s293_s16 = ssub.s32 %s947_s28, %s1044_s14  ;;  %p306_p0 = scmp.ne.s32.totalorder %s943_s27, %s939_s26 }
   0xc   : > { %p294_p1 = scmp.eq.s32.totalorder %s293_s16, 0  ;;  %p307_p2 = scmp.eq.s32.totalorder %s1040_s29, 1 }
   0xd   : > { %p312_p3 = scmp.ne.s32.totalorder %s939_s26, %s935_s25  ;;  %p313_p4 = scmp.eq.s32.totalorder %s798_s30, 1 }
   0xe   : > { %s1055_s17 = scalar_select %p294_p1, %s943_s27, %s296_s15  }
   0xf   : > { %p1057_p5 = por %p307_p2, %p306_p0  ;;  %p1061_p6 = por %p313_p4, %p312_p3 }
  0x10   : > { %1202 = sst [smem:[#allocation6_spill]] %s1055_s17  ;;  %p801_p7 = scmp.ge.s32.totalorder %s947_s28, 1 }
  0x11   : > { %p401_p8 = scmp.lt.s32.totalorder %s947_s28, 3 }
  0x13   : > { %p402_p9 = pnand %p801_p7, %p401_p8 }
  0x14   : > { %s1205_s2 = sld [smem:[#allocation9_spill]] (!%p402_p9)  ;;  %p452_p10 = scmp.lt.s32.totalorder (!%p402_p9), %s1040_s29, 1 }
  0x15   : > { %405 = sbr.rel (%p402_p9) target bundleno = 631 (0x277), region = 68  ;;  %s1206_s0 = sld [smem:[#allocation7_spill]] (!%p402_p9) }
  0x16   : > { %s1207_s4 = sld [smem:[#allocation11_spill]] (!%p402_p9)  ;;  %s1105_s23 = sand.u32 (!%p402_p9), 1, %s939_s26  }
  0x17   : > { %s1208_s3 = sld [smem:[#allocation10_spill]] (!%p402_p9)  ;;  %s828_s21 = smul.u32 (!%p402_p9), 24, %s1105_s23 }
  0x18   : > { %s1209_s1 = sld [smem:[#allocation8_spill]] (!%p402_p9)  ;;  %s1196_s15 = sshll.u32 (!%p402_p9), %s1040_s29, 3 }
  0x19   : > { %s1115_s22 = scalar_lea.vmem (!%p402_p9), [#allocation4], %s828_s21  ;;  %s648_s21 = scalar_lea.hbm (!%p402_p9), %s1194_s12, %s1196_s15 }
  0x1a   : > { %v827_v0 = vld [vmem:[%s1205_s2 + $0x8] sm:$0xff]  ;;  %v826_v1 = vld [vmem:[%s1205_s2] sm:$0xff]  ;;  %s1075_s24 = scalar_select %p452_p10, %s1040_s29, 1  ;;  %vm483_vm0 = vcmask 261120   ;;  %vm511_vm1 = vcmask 1043456   ;;  %vm507_vm2 = vcmask 64512  }
  0x1b   : > { %493 = vmatpush.bf16.msra.mxu0 %v827_v0  ;;  %v529_v5 = vld [vmem:[%s1188_s6] sm:$0xf] }
  0x1c   : > { %s803_s30 = sshll.u32 %s1075_s24, 3  ;;  %v502_v4 = vld [vmem:[%s1207_s4] sm:$0xf]  ;;  %v535_v7 = vsel %vm511_vm1, %v529_v5, 0 }
  0x1d   : > { %s455_s17 = scalar_lea.vmem %s1206_s0, %s803_s30  ;;  %v513_v6 = vsel %vm511_vm1, %v502_v4, 0  ;;  %544 = vmatpush.bf16.msra.mxu2 %v535_v7  ;;  %v868_v8 = vld [vmem:[%s1208_s3] ss:$0 sm:$0xff]  ;;  %s652_s0 = sshll.u32 %s648_s21, 4  ;;  %s653_s0 = int_to_ptr.hbm [resolvable:$true] %s652_s0 }
  0x1e   : > { %v461_v2 = vld [vmem:[%s455_s17] sm:$0xff]  ;;  %522 = vmatpush.bf16.msra.mxu1 %v513_v6  ;;  %s459_s16 = scalar_lea.vmem %s1209_s1, %s803_s30  ;;  %s802_s17 = sshll.u32 %s1105_s23, 3 }
  0x1f   : > { %494 = vmatpush.bf16.msra.mxu0 %v826_v1  ;;  %v462_v3 = vpack.c.bf16 %v461_v2, %v461_v2  ;;  %v558_v14 = vld [vmem:[%s1190_s8] sm:$0xf]  ;;  %s445_s24 = scalar_lea.vmem [#allocation2], %s802_s17  ;;  %s899_s20 = sshra.s32 %s653_s0, 4  ;;  %s900_s20 = int_to_ptr.hbm [resolvable:$true] %s899_s20 }
  0x20   : > { %v567_v15 = vsel %vm511_vm1, %v558_v14, 0  ;;  %v869_v16 = vld [vmem:[%s1187_s5] ss:$0 sm:$0xff]  ;;  %s650_s30 = sshll.u32 %s445_s24, 4  ;;  %s901_s15 = scalar_lea.hbm %s900_s20, 8  ;;  %s651_s30 = int_to_ptr.vmem [resolvable:$true] %s650_s30 }
  0x21   : > { %576 = vmatpush.bf16.msra.mxu3 %v567_v15  ;;  %v584_v19 = vld [vmem:[%s1192_s10] sm:$0xf]  ;;  %p902_p11 = scmp.ne.s32.totalorder %s900_s20, %s901_s15  ;;  %s905_s1 = scalar_lea.hbm %s1194_s12, 16 }
  0x22   : > { %813 = vmatmul.msk.bf16.vlgmr.msra.gmra.mxu0 %vm483_vm0, %v462_v3  ;;  %v593_v20 = vsel %vm511_vm1, %v584_v19, 0  ;;  %v870_v21 = vld [vmem:[%s1189_s7] ss:$0 sm:$0xff]  ;;  %p906_p0 = scmp.lt.s32.totalorder %s900_s20, %s1194_s12  ;;  %p907_p1 = scmp.lt.s32.totalorder %s905_s1, %s901_s15 }
  0x23   : > { %602 = vmatpush.bf16.msrb.mxu1 %v593_v20  ;;  %v551_v30 = vld [vmem:[%s459_s16] sm:$0xff]  ;;  %s634_s16 = scalar_lea.sflag [#allocation3], %s1105_s23  ;;  %p903_p12 = pnand %p902_p11, %p1057_p5 }
  0x24   : > { %v871_v35 = vld [vmem:[%s1191_s9] ss:$0 sm:$0xff]  ;;  %p908_p2 = por %p907_p1, %p906_p0 }
  0x25   : > { %v872_v41 = vld [vmem:[%s1193_s11] ss:$0 sm:$0xff]  ;;  %p904_p13 = pneg %p903_p12 }
  0x27   : > { %p909_p3 = pnand %p908_p2, %p904_p13 }
  0x9f   : > { %v496_v9 = vpop.f32.mrf.mxu0 }
  0xa0   : > { %v497_v10 = vadd.f32 %v868_v8, %v496_v9 }
  0xa2   : > { %873 = vtanh.f32 %v497_v10 }
  0xa7   : > { %v498_v11 = vpop.f32.mrf.mxu0 }
  0xa8   : > { %v874_v12 = vpop.eup %873 }
  0xa9   : > { %v501_v13 = vpack.c.bf16 %v874_v12, %v874_v12 }
  0xab   : > { %814 = vmatmul.msk.bf16.vlgmr.msra.gmra.mxu1 %vm507_vm2, %v501_v13  ;;  %815 = vmatmul.msk.bf16.vlgmr.msra.gmra.mxu2 %vm507_vm2, %v501_v13 }
 0x128   : > { %v524_v17 = vpop.f32.mrf.mxu1 }
 0x129   : > { %v525_v18 = vadd.f32 %v869_v16, %v524_v17 }
 0x12b   : > { %875 = vtanh.f32 %v525_v18 }
 0x12e   : > { %v546_v22 = vpop.f32.mrf.mxu2 }
 0x12f   : > { %v547_v23 = vadd.f32 %v870_v21, %v546_v22 }
 0x130   : > { %v526_v24 = vpop.f32.mrf.mxu1 }
 0x131   : > { %v876_v25 = vpop.eup %875  ;;  %877 = vtanh.f32 %v547_v23 }
 0x132   : > { %819 = vst.msk [vmem:[%s1115_s22 + $0x8] sm:$0xff] %vm507_vm2, %v876_v25 }
 0x136   : > { %v548_v26 = vpop.f32.mrf.mxu2 }
 0x137   : > { %v878_v27 = vpop.eup %877 }
 0x138   : > { %v552_v28 = vmul.f32 0.5, %v878_v27  ;;  %820 = vst.msk [vmem:[%s1115_s22 + $0x10] sm:$0xff] %vm507_vm2, %v878_v27 }
 0x13a   : > { %v553_v29 = vmul.f32 1.442695, %v552_v28 }
 0x13c   : > { %879 = vpow2.f32 %v553_v29 }
 0x142   : > { %v880_v31 = vpop.eup %879 }
 0x143   : > { %v555_v32 = vmul.f32 %v880_v31, %v551_v30 }
 0x145   : > { %v556_v33 = vadd.f32 %v876_v25, %v555_v32 }
 0x147   : > { %v557_v34 = vpack.c.bf16 %v556_v33, %v556_v33  ;;  %628 = vst.msk [vmem:[%s1115_s22] sm:$0xff] %vm507_vm2, %v556_v33 }
 0x149   : > { %816 = vmatmul.msk.bf16.vlgmr.msra.gmra.mxu3 %vm507_vm2, %v557_v34 }
 0x1cc   : > { %v578_v36 = vpop.f32.mrf.mxu3 }
 0x1cd   : > { %v579_v37 = vadd.f32 %v871_v35, %v578_v36 }
 0x1cf   : > { %v582_v38 = vmax.f32 %v579_v37, 0.0 }
 0x1d1   : > { %v583_v39 = vpack.c.bf16 %v582_v38, %v582_v38 }
 0x1d3   : > { %817 = vmatmul.msk.bf16.vlgmr.msrb.gmra.mxu1 %vm507_vm2, %v583_v39 }
 0x1d4   : > { %v580_v40 = vpop.f32.mrf.mxu3 }
 0x250   : > { %v604_v42 = vpop.f32.mrf.mxu1 }
 0x251   : > { %v605_v43 = vadd.f32 %v872_v41, %v604_v42 }
 0x253   : > { %v818_v44 = vmul.f32 -1.442695, %v605_v43 }
 0x255   : > { %881 = vpow2.f32 %v818_v44 }
 0x258   : > { %v606_v45 = vpop.f32.mrf.mxu1 }
 0x25b   : > { %v882_v46 = vpop.eup %881 }
 0x25c   : > { %v611_v47 = vadd.f32 1.0, %v882_v46 }
 0x25e   : > { %883 = vrcp.f32 %v611_v47  ;;  %v623_v51 = vand.u32 2147483648, %v611_v47  ;;  %v621_v53 = vand.u32 2147483647, %v611_v47  ;;  %vm617_vm4 = vweird.f32 %v611_v47 }
 0x260   : > { %v624_v55 = vor.u32 1.1754944e-38, %v623_v51  ;;  %vm622_vm6 = vcmp.eq.f32.partialorder %v621_v53, 8.507059e+37 }
 0x264   : > { %v884_v48 = vpop.eup %883 }
 0x265   : > { %v613_v49 = vmul.f32 %v884_v48, %v611_v47  ;;  %vm618_vm3 = vweird.f32 %v884_v48 }
 0x266   : > { %vm619_vm5 = vmor %vm617_vm4, %vm618_vm3 }
 0x267   : > { %v614_v50 = vsub.f32 1.0, %v613_v49 }
 0x269   : > { %v615_v52 = vmul.f32 %v884_v48, %v614_v50 }
 0x26b   : > { %v616_v54 = vadd.f32 %v884_v48, %v615_v52 }
 0x26d   : > { %v620_v56 = vsel %vm619_vm5, %v884_v48, %v616_v54 }
 0x26e   : > { %v625_v57 = vsel %vm622_vm6, %v624_v55, %v620_v56 }
 0x26f   : > { %627 = vst.msk [vmem:[%s445_s24] sm:$0xff] %vm483_vm0, %v625_v57 }
 0x270   : > { %912 = shalt.err (!%p909_p3)
}
 0x271   : > { %829 = dma.vmem_to_hbm [thread:$0]  (%p1057_p5), %s651_s30, 128, %s653_s0, %s634_s16   ;;  %v693_v58 = vld [vmem:[%s1115_s22] sm:$0xff] (%p1057_p5)  ;;  %v695_v59 = vld [vmem:[%s1115_s22 + $0x8] sm:$0xff] (%p1057_p5)  ;;  %v697_v60 = vld [vmem:[%s1115_s22 + $0x10] sm:$0xff] (%p1057_p5) }
 0x272   : > { %658 = sbr.rel (!%p1057_p5) target bundleno = 631 (0x277), region = 76  ;;  %s1210_s23 = sshll.u32 (%p1057_p5), %s1040_s29, 3 }
 0x273   : > { %s660_s2 = scalar_lea.vmem (%p1057_p5), %s1195_s13, %s1210_s23 }
 0x274   : > { %694 = vst [vmem:[%s660_s2] sm:$0xff] (%p1057_p5), %v693_v58 }
 0x275   : > { %696 = vst [vmem:[%s660_s2 + $0x10] sm:$0xff] (%p1057_p5), %v695_v59 }
 0x276   : > { %698 = vst [vmem:[%s660_s2 + $0x20] sm:$0xff] (%p1057_p5), %v697_v60 }
 0x277 PF: > { %p835_p4 = scmp.ge.s32.totalorder %s947_s28, 2  ;;  %s710_s0 = sand.u32 1, %s935_s25  }
 0x278   : > { %s711_s1 = scalar_lea.sflag [#allocation3], %s710_s0 }
 0x279   : > { %p832_p5 = pnand %p835_p4, %p1061_p6 }
 0x27b   : > { %p833_p7 = pneg %p832_p5 }
 0x27d   : > { %930 = dma.done.wait (%p833_p7), %s711_s1, 128  }
 0x27e   : > { %932 = vsyncadd (%p833_p7), %s711_s1, 4294967168  ;;  %s1211_s3 = sld [smem:[#allocation6_spill]]  ;;  %p24_p8 = scmp.ge.s32.totalorder %s1044_s14, 4  }
 0x27f   : > { %s1212_s25 = smov %s939_s26  ;;  %s1213_s26 = smov %s943_s27 }
 0x280   : > { %s1215_s28 = smov %s1044_s14  ;;  %26 = sbr.rel (!%p24_p8) target bundleno = 9 (0x9), region = 158 }
 0x284   : > { %s1214_s27 = smov %s1211_s3 }
 0x285   :  { %724 = vsyncpa [#allocation3], 1 }
 0x286   :  { %726 = vsyncpa [#allocation3 + $0x1], 1 }

</bundles_post_ra>
